<compile_context>
chip_gen: v6e
topology: v6e:2x2x1
jax: 0.10.0
libtpu: 0.0.40
codegen_flags: <defaults>
</compile_context>

<pallas_src>
import jax
import jax.numpy as jnp
from jax.experimental import pallas as pl
from jax.experimental.pallas import tpu as pltpu

_LANE = 128
_SUBLANE = 8


def _round_up(v, m):
    return ((v + m - 1) // m) * m


def _vmem_capacity_bytes():
    try:
        return int(pltpu.get_tpu_info().vmem_capacity_bytes)
    except Exception:
        return 64 * 1024 * 1024  # conservative default (v7x per-TC VMEM)


def _mlp_kernel(x_ref, w1_ref, b1_ref, w2_ref, b2_ref, o_ref, h_ref):
    """out[i, j] = relu(x[i] @ W1 + b1) @ W2[:, j] + b2[j].

    Grid = (batch_tiles, n_tiles).  Layer 1 runs once per batch tile (j == 0) and its
    result is cached as bf16 in the h scratch, so tiling W2 over N never recomputes it.
    x arrives as f32 and is cast to bf16 in-kernel; both dots accumulate in f32.
    """
    @pl.when(pl.program_id(1) == 0)
    def _():
        xb = x_ref[...].astype(jnp.bfloat16)                       # in-kernel cast
        h = jnp.dot(xb, w1_ref[...], preferred_element_type=jnp.float32)
        # Fused bias + relu + downcast: only one (tm, hp) f32 temporary is live.
        h_ref[...] = jnp.maximum(h + b1_ref[...], 0.0).astype(jnp.bfloat16)

    out = jnp.dot(h_ref[...], w2_ref[...], preferred_element_type=jnp.float32)
    o_ref[...] = (out + b2_ref[...]).astype(o_ref.dtype)


def prepare_params(w1, b1, w2, b2):
    """Pad / cast weights ONCE (hoisted out of the per-call path).

    Hidden / output dims are zero-padded to lane width (128); padding is exact:
    zero weight columns + zero bias -> relu(0) = 0 -> multiplied by zero W2 rows,
    and the extra output lanes are sliced off by the caller.
    """
    in_dim, hidden = w1.shape
    out_dim = w2.shape[1]
    hp = _round_up(hidden, _LANE)
    npad = _round_up(out_dim, _LANE)
    w1p = jnp.pad(w1, ((0, 0), (0, hp - hidden))).astype(jnp.bfloat16)
    b1p = jnp.pad(b1, (0, hp - hidden)).astype(jnp.float32).reshape(1, hp)
    w2p = jnp.pad(w2, ((0, hp - hidden), (0, npad - out_dim))).astype(jnp.bfloat16)
    b2p = jnp.pad(b2, (0, npad - out_dim)).astype(jnp.float32).reshape(1, npad)
    return {"w1": w1p, "b1": b1p, "w2": w2p, "b2": b2p, "out_dim": out_dim}


def base_nn_forward(x, params, *, block_batch=512, out_dtype=jnp.float32):
    """Fused forward pass of base_NN: y = relu(x @ W1 + b1) @ W2 + b2."""
    w1p, b1p, w2p, b2p = params["w1"], params["b1"], params["w2"], params["b2"]
    out_dim = params["out_dim"]
    batch, in_dim = x.shape
    assert w1p.shape[0] == in_dim, "x feature dim must match prepared W1"
    hp = w1p.shape[1]
    npad = w2p.shape[1]
    out_bytes = jnp.dtype(out_dtype).itemsize

    cap = _vmem_capacity_bytes()
    budget = int(0.80 * cap)          # leave compiler-scratch headroom on every chip

    # --- N (output-feature) tiling: keep W2 fully VMEM-resident when it fits
    # comfortably, otherwise fall back to lane-dense N tiles (v7x 64 MiB safety).
    def _weight_bytes(tn_):
        return (in_dim * hp + hp * tn_) * 2 + (hp + tn_) * 4

    tn = npad
    while tn > _LANE and _weight_bytes(tn) > budget // 2:
        tn = max(_LANE, _round_up(tn // 2, _LANE))
    grid_n = pl.cdiv(npad, tn)
    # TODO(synk): add a K (hidden-dim) tiling fallback with an f32 accumulator for
    # layers where in_dim*hp bf16 alone exceeds the VMEM budget.

    # --- Batch tiling: tm a multiple of 8; >= 2 tiles so both v7x TCs get work.
    tm = _round_up(max(1, min(block_batch, batch)), _SUBLANE)
    if pl.cdiv(batch, tm) < 2 and batch > _SUBLANE:
        tm = _round_up(pl.cdiv(batch, 2), _SUBLANE)

    def _need_bytes(tm_):
        w2_bufs = 2 if grid_n > 1 else 1
        return (2 * tm_ * in_dim * 4                 # x tiles (f32, double-buffered)
                + 2 * tm_ * tn * out_bytes           # out tiles (double-buffered)
                + in_dim * hp * 2 + hp * 4           # resident W1 + b1
                + w2_bufs * (hp * tn * 2 + tn * 4)   # W2 + b2
                + tm_ * hp * 2                       # h scratch (bf16)
                + tm_ * hp * 4 + tm_ * tn * 4)       # in-kernel f32 temporaries

    while _need_bytes(tm) > budget and tm > _SUBLANE:
        tm = max(_SUBLANE, _round_up(tm // 2, _SUBLANE))
    grid_m = pl.cdiv(batch, tm)

    # Scheduling hint: this kernel is HBM-bound at small K, so bytes dominate.
    flops = 2 * grid_m * tm * in_dim * hp + 2 * grid_m * tm * hp * npad
    bytes_accessed = (x.size * 4 + (w1p.size + w2p.size) * 2
                      + (b1p.size + b2p.size) * 4 + batch * npad * out_bytes)

    def _build(single_buffer_weights):
        def _spec(shape, index_map, constant):
            if constant and single_buffer_weights:
                return pl.BlockSpec(shape, index_map, pipeline_mode=pl.Buffered(1))
            return pl.BlockSpec(shape, index_map)

        in_specs = [
            pl.BlockSpec((tm, in_dim), lambda i, j: (i, 0)),           # x: f32, batch-tiled
            _spec((in_dim, hp), lambda i, j: (0, 0), True),            # W1: VMEM-resident
            _spec((1, hp), lambda i, j: (0, 0), True),                 # b1: VMEM-resident
            _spec((hp, tn), lambda i, j: (0, j), grid_n == 1),         # W2: resident or N-tiled
            _spec((1, tn), lambda i, j: (0, j), grid_n == 1),          # b2
        ]
        return pl.pallas_call(
            _mlp_kernel,
            out_shape=jax.ShapeDtypeStruct((batch, npad), out_dtype),
            grid=(grid_m, grid_n),
            in_specs=in_specs,
            out_specs=pl.BlockSpec((tm, tn), lambda i, j: (i, j)),     # lane-dense store
            scratch_shapes=[pltpu.VMEM((tm, hp), jnp.bfloat16)],       # cached hidden act
            compiler_params=pltpu.CompilerParams(
                dimension_semantics=("parallel", "arbitrary"),
                vmem_limit_bytes=budget,
            ),
            cost_estimate=pl.CostEstimate(
                flops=flops, transcendentals=0, bytes_accessed=bytes_accessed),
        )

    try:
        out_padded = _build(True)(x, w1p, b1p, w2p, b2p)
    except Exception:
        # Fallback if this JAX build rejects pipeline_mode=pl.Buffered(1) on top-level
        # pallas_call BlockSpecs: let the constant weight blocks double-buffer instead.
        out_padded = _build(False)(x, w1p, b1p, w2p, b2p)

    # NOTE: callers that can consume the lane-padded output directly should skip this
    # slice (it is an extra HBM pass); kept so the public API matches nn.Linear output.
    return out_padded[:, :out_dim]


def init_params(key, input_dim, hidden_dim, output_dim):
    """Deterministic init mimicking nn.Linear's U(-1/sqrt(fan_in), 1/sqrt(fan_in))."""
    k1, k2, k3, k4 = jax.random.split(key, 4)
    bound1 = 1.0 / jnp.sqrt(input_dim)
    bound2 = 1.0 / jnp.sqrt(hidden_dim)
    w1 = jax.random.uniform(k1, (input_dim, hidden_dim), jnp.float32, -bound1, bound1)
    b1 = jax.random.uniform(k2, (hidden_dim,), jnp.float32, -bound1, bound1)
    w2 = jax.random.uniform(k3, (hidden_dim, output_dim), jnp.float32, -bound2, bound2)
    b2 = jax.random.uniform(k4, (output_dim,), jnp.float32, -bound2, bound2)
    return w1, b1, w2, b2


if __name__ == "__main__":
    input_dim, hidden_dim, output_dim = 32, 64, 16
    batch = 32

    key = jax.random.PRNGKey(0)
    kx, kparam = jax.random.split(key)
    x = jax.random.normal(kx, (batch, input_dim), jnp.float32)
    w1, b1, w2, b2 = init_params(kparam, input_dim, hidden_dim, output_dim)

    # Pad/cast the weights once (hoisted out of the per-call path).
    params = prepare_params(w1, b1, w2, b2)

    # block_batch=8 so the toy batch exercises a multi-step pipelined batch grid.
    out = jax.block_until_ready(base_nn_forward(x, params, block_batch=8))

    # Pure-JAX reference with the same bf16 matmul inputs / f32 accumulation.
    xb = x.astype(jnp.bfloat16)
    h_ref = jnp.maximum(
        jnp.dot(xb, w1.astype(jnp.bfloat16), preferred_element_type=jnp.float32) + b1, 0.0)
    ref = jnp.dot(h_ref.astype(jnp.bfloat16), w2.astype(jnp.bfloat16),
                  preferred_element_type=jnp.float32) + b2

    assert out.shape == (batch, output_dim)
    assert jnp.allclose(out, ref, atol=2e-2, rtol=2e-2), float(jnp.max(jnp.abs(out - ref)))

    print("KERNEL_OK")
</pallas_src>

<mosaic_0001>
module attributes {stable_mosaic.version = 11 : i64} {
  func.func @_mlp_kernel(%arg0: i32, %arg1: i32, %arg2: memref<8x32xf32, #tpu.memory_space<vmem>>, %arg3: memref<32x128xbf16, #tpu.memory_space<vmem>>, %arg4: memref<1x128xf32, #tpu.memory_space<vmem>>, %arg5: memref<128x128xbf16, #tpu.memory_space<vmem>>, %arg6: memref<1x128xf32, #tpu.memory_space<vmem>>, %arg7: memref<8x128xf32, #tpu.memory_space<vmem>>, %arg8: memref<8x128xbf16, #tpu.memory_space<vmem>>) attributes {dimension_semantics = [#tpu.dimension_semantics<parallel>, #tpu.dimension_semantics<arbitrary>], iteration_bounds = array<i64: 4, 1>, scalar_prefetch = 0 : i64, scratch_operands = 1 : i64, tpu.core_type = #tpu.core_type<tc>, window_params = [{transform_indices = @transform_0, window_bounds = array<i64: 8, 32>}, {pipeline_mode = #tpu.pipeline_mode<synchronous>, transform_indices = @transform_1, window_bounds = array<i64: 32, 128>}, {pipeline_mode = #tpu.pipeline_mode<synchronous>, transform_indices = @transform_2, window_bounds = array<i64: 1, 128>}, {pipeline_mode = #tpu.pipeline_mode<synchronous>, transform_indices = @transform_3, window_bounds = array<i64: 128, 128>}, {pipeline_mode = #tpu.pipeline_mode<synchronous>, transform_indices = @transform_4, window_bounds = array<i64: 1, 128>}, {transform_indices = @transform_5, window_bounds = array<i64: 8, 128>}]} {
    %c0_i32 = arith.constant 0 : i32
    %0 = arith.cmpi eq, %arg1, %c0_i32 : i32
    %1 = arith.extui %0 : i1 to i32
    %c0_i32_0 = arith.constant 0 : i32
    %2 = arith.cmpi ne, %1, %c0_i32_0 : i32
    scf.if %2 {
      %c0_8 = arith.constant 0 : index
      %c0_9 = arith.constant 0 : index
      %10 = vector.load %arg2[%c0_8, %c0_9] : memref<8x32xf32, #tpu.memory_space<vmem>>, vector<8x32xf32>
      %11 = arith.truncf %10 : vector<8x32xf32> to vector<8x32xbf16>
      %c0_10 = arith.constant 0 : index
      %c0_11 = arith.constant 0 : index
      %12 = vector.load %arg3[%c0_10, %c0_11] : memref<32x128xbf16, #tpu.memory_space<vmem>>, vector<32x128xbf16>
      %cst_12 = arith.constant dense<0.000000e+00> : vector<8x128xf32>
      %13 = tpu.matmul %11, %12, %cst_12 {dimension_numbers = #tpu.dot_dimension_numbers<[1], [0], [0], [1], [0, 0, 1, 1], [], []>} : vector<8x32xbf16>, vector<32x128xbf16>, vector<8x128xf32> -> vector<8x128xf32>
      %c0_13 = arith.constant 0 : index
      %c0_14 = arith.constant 0 : index
      %14 = vector.load %arg4[%c0_13, %c0_14] : memref<1x128xf32, #tpu.memory_space<vmem>>, vector<1x128xf32>
      %15 = vector.broadcast %14 : vector<1x128xf32> to vector<8x128xf32>
      %16 = arith.addf %13, %15 : vector<8x128xf32>
      %cst_15 = arith.constant 0.000000e+00 : f32
      %17 = vector.broadcast %cst_15 : f32 to vector<8x128xf32>
      %18 = arith.maximumf %16, %17 : vector<8x128xf32>
      %19 = arith.truncf %18 : vector<8x128xf32> to vector<8x128xbf16>
      %c0_16 = arith.constant 0 : index
      %c0_17 = arith.constant 0 : index
      %20 = vector.load %arg8[%c0_16, %c0_17] : memref<8x128xbf16, #tpu.memory_space<vmem>>, vector<8x128xbf16>
      tpu.vector_store %arg8[%c0_16, %c0_17], %19 {strides = array<i32>} : memref<8x128xbf16, #tpu.memory_space<vmem>>, vector<8x128xbf16>,
    } else {
    }
    %c0 = arith.constant 0 : index
    %c0_1 = arith.constant 0 : index
    %3 = vector.load %arg8[%c0, %c0_1] : memref<8x128xbf16, #tpu.memory_space<vmem>>, vector<8x128xbf16>
    %c0_2 = arith.constant 0 : index
    %c0_3 = arith.constant 0 : index
    %4 = vector.load %arg5[%c0_2, %c0_3] : memref<128x128xbf16, #tpu.memory_space<vmem>>, vector<128x128xbf16>
    %cst = arith.constant dense<0.000000e+00> : vector<8x128xf32>
    %5 = tpu.matmul %3, %4, %cst {dimension_numbers = #tpu.dot_dimension_numbers<[1], [0], [0], [1], [0, 0, 1, 1], [], []>} : vector<8x128xbf16>, vector<128x128xbf16>, vector<8x128xf32> -> vector<8x128xf32>
    %c0_4 = arith.constant 0 : index
    %c0_5 = arith.constant 0 : index
    %6 = vector.load %arg6[%c0_4, %c0_5] : memref<1x128xf32, #tpu.memory_space<vmem>>, vector<1x128xf32>
    %7 = vector.broadcast %6 : vector<1x128xf32> to vector<8x128xf32>
    %8 = arith.addf %5, %7 : vector<8x128xf32>
    %c0_6 = arith.constant 0 : index
    %c0_7 = arith.constant 0 : index
    %9 = vector.load %arg7[%c0_6, %c0_7] : memref<8x128xf32, #tpu.memory_space<vmem>>, vector<8x128xf32>
    tpu.vector_store %arg7[%c0_6, %c0_7], %8 {strides = array<i32>} : memref<8x128xf32, #tpu.memory_space<vmem>>, vector<8x128xf32>,
    return
  }
  func.func @transform_0(%arg0: i32, %arg1: i32) -> (i32, i32) {
    %c0_i32 = arith.constant 0 : i32
    %c0_i32_0 = arith.constant 0 : i32
    return %arg0, %c0_i32 : i32, i32
  }
  func.func @transform_1(%arg0: i32, %arg1: i32) -> (i32, i32) {
    %c0_i32 = arith.constant 0 : i32
    %c0_i32_0 = arith.constant 0 : i32
    %c0_i32_1 = arith.constant 0 : i32
    return %c0_i32, %c0_i32_0 : i32, i32
  }
  func.func @transform_2(%arg0: i32, %arg1: i32) -> (i32, i32) {
    %c0_i32 = arith.constant 0 : i32
    %c0_i32_0 = arith.constant 0 : i32
    %c0_i32_1 = arith.constant 0 : i32
    return %c0_i32, %c0_i32_0 : i32, i32
  }
  func.func @transform_3(%arg0: i32, %arg1: i32) -> (i32, i32) {
    %c0_i32 = arith.constant 0 : i32
    %c0_i32_0 = arith.constant 0 : i32
    return %c0_i32, %arg1 : i32, i32
  }
  func.func @transform_4(%arg0: i32, %arg1: i32) -> (i32, i32) {
    %c0_i32 = arith.constant 0 : i32
    %c0_i32_0 = arith.constant 0 : i32
    return %c0_i32, %arg1 : i32, i32
  }
  func.func @transform_5(%arg0: i32, %arg1: i32) -> (i32, i32) {
    %c0_i32 = arith.constant 0 : i32
    return %arg0, %arg1 : i32, i32
  }
}

module attributes {stable_mosaic.version = 11 : i64} {
  func.func @_mlp_kernel(%arg0: i32, %arg1: i32, %arg2: memref<8x32xf32, #tpu.memory_space<vmem>>, %arg3: memref<32x128xbf16, #tpu.memory_space<vmem>>, %arg4: memref<1x128xf32, #tpu.memory_space<vmem>>, %arg5: memref<128x128xbf16, #tpu.memory_space<vmem>>, %arg6: memref<1x128xf32, #tpu.memory_space<vmem>>, %arg7: memref<8x128xf32, #tpu.memory_space<vmem>>, %arg8: memref<8x128xbf16, #tpu.memory_space<vmem>>) attributes {dimension_semantics = [#tpu.dimension_semantics<parallel>, #tpu.dimension_semantics<arbitrary>], iteration_bounds = array<i64: 4, 1>, scalar_prefetch = 0 : i64, scratch_operands = 1 : i64, tpu.core_type = #tpu.core_type<tc>, window_params = [{transform_indices = @transform_0, window_bounds = array<i64: 8, 32>}, {pipeline_mode = #tpu.pipeline_mode<synchronous>, transform_indices = @transform_1, window_bounds = array<i64: 32, 128>}, {pipeline_mode = #tpu.pipeline_mode<synchronous>, transform_indices = @transform_2, window_bounds = array<i64: 1, 128>}, {transform_indices = @transform_3, window_bounds = array<i64: 128, 128>}, {transform_indices = @transform_4, window_bounds = array<i64: 1, 128>}, {transform_indices = @transform_5, window_bounds = array<i64: 8, 128>}]} {
    %c0_i32 = arith.constant 0 : i32
    %0 = arith.cmpi eq, %arg1, %c0_i32 : i32
    %1 = arith.extui %0 : i1 to i32
    %c0_i32_0 = arith.constant 0 : i32
    %2 = arith.cmpi ne, %1, %c0_i32_0 : i32
    scf.if %2 {
      %c0_8 = arith.constant 0 : index
      %c0_9 = arith.constant 0 : index
      %10 = vector.load %arg2[%c0_8, %c0_9] : memref<8x32xf32, #tpu.memory_space<vmem>>, vector<8x32xf32>
      %11 = arith.truncf %10 : vector<8x32xf32> to vector<8x32xbf16>
      %c0_10 = arith.constant 0 : index
      %c0_11 = arith.constant 0 : index
      %12 = vector.load %arg3[%c0_10, %c0_11] : memref<32x128xbf16, #tpu.memory_space<vmem>>, vector<32x128xbf16>
      %cst_12 = arith.constant dense<0.000000e+00> : vector<8x128xf32>
      %13 = tpu.matmul %11, %12, %cst_12 {dimension_numbers = #tpu.dot_dimension_numbers<[1], [0], [0], [1], [0, 0, 1, 1], [], []>} : vector<8x32xbf16>, vector<32x128xbf16>, vector<8x128xf32> -> vector<8x128xf32>
      %c0_13 = arith.constant 0 : index
      %c0_14 = arith.constant 0 : index
      %14 = vector.load %arg4[%c0_13, %c0_14] : memref<1x128xf32, #tpu.memory_space<vmem>>, vector<1x128xf32>
      %15 = vector.broadcast %14 : vector<1x128xf32> to vector<8x128xf32>
      %16 = arith.addf %13, %15 : vector<8x128xf32>
      %cst_15 = arith.constant 0.000000e+00 : f32
      %17 = vector.broadcast %cst_15 : f32 to vector<8x128xf32>
      %18 = arith.maximumf %16, %17 : vector<8x128xf32>
      %19 = arith.truncf %18 : vector<8x128xf32> to vector<8x128xbf16>
      %c0_16 = arith.constant 0 : index
      %c0_17 = arith.constant 0 : index
      %20 = vector.load %arg8[%c0_16, %c0_17] : memref<8x128xbf16, #tpu.memory_space<vmem>>, vector<8x128xbf16>
      tpu.vector_store %arg8[%c0_16, %c0_17], %19 {strides = array<i32>} : memref<8x128xbf16, #tpu.memory_space<vmem>>, vector<8x128xbf16>,
    } else {
    }
    %c0 = arith.constant 0 : index
    %c0_1 = arith.constant 0 : index
    %3 = vector.load %arg8[%c0, %c0_1] : memref<8x128xbf16, #tpu.memory_space<vmem>>, vector<8x128xbf16>
    %c0_2 = arith.constant 0 : index
    %c0_3 = arith.constant 0 : index
    %4 = vector.load %arg5[%c0_2, %c0_3] : memref<128x128xbf16, #tpu.memory_space<vmem>>, vector<128x128xbf16>
    %cst = arith.constant dense<0.000000e+00> : vector<8x128xf32>
    %5 = tpu.matmul %3, %4, %cst {dimension_numbers = #tpu.dot_dimension_numbers<[1], [0], [0], [1], [0, 0, 1, 1], [], []>} : vector<8x128xbf16>, vector<128x128xbf16>, vector<8x128xf32> -> vector<8x128xf32>
    %c0_4 = arith.constant 0 : index
    %c0_5 = arith.constant 0 : index
    %6 = vector.load %arg6[%c0_4, %c0_5] : memref<1x128xf32, #tpu.memory_space<vmem>>, vector<1x128xf32>
    %7 = vector.broadcast %6 : vector<1x128xf32> to vector<8x128xf32>
    %8 = arith.addf %5, %7 : vector<8x128xf32>
    %c0_6 = arith.constant 0 : index
    %c0_7 = arith.constant 0 : index
    %9 = vector.load %arg7[%c0_6, %c0_7] : memref<8x128xf32, #tpu.memory_space<vmem>>, vector<8x128xf32>
    tpu.vector_store %arg7[%c0_6, %c0_7], %8 {strides = array<i32>} : memref<8x128xf32, #tpu.memory_space<vmem>>, vector<8x128xf32>,
    return
  }
  func.func @transform_0(%arg0: i32, %arg1: i32) -> (i32, i32) {
    %c0_i32 = arith.constant 0 : i32
    %c0_i32_0 = arith.constant 0 : i32
    return %arg0, %c0_i32 : i32, i32
  }
  func.func @transform_1(%arg0: i32, %arg1: i32) -> (i32, i32) {
    %c0_i32 = arith.constant 0 : i32
    %c0_i32_0 = arith.constant 0 : i32
    %c0_i32_1 = arith.constant 0 : i32
    return %c0_i32, %c0_i32_0 : i32, i32
  }
  func.func @transform_2(%arg0: i32, %arg1: i32) -> (i32, i32) {
    %c0_i32 = arith.constant 0 : i32
    %c0_i32_0 = arith.constant 0 : i32
    %c0_i32_1 = arith.constant 0 : i32
    return %c0_i32, %c0_i32_0 : i32, i32
  }
  func.func @transform_3(%arg0: i32, %arg1: i32) -> (i32, i32) {
    %c0_i32 = arith.constant 0 : i32
    %c0_i32_0 = arith.constant 0 : i32
    return %c0_i32, %arg1 : i32, i32
  }
  func.func @transform_4(%arg0: i32, %arg1: i32) -> (i32, i32) {
    %c0_i32 = arith.constant 0 : i32
    %c0_i32_0 = arith.constant 0 : i32
    return %c0_i32, %arg1 : i32, i32
  }
  func.func @transform_5(%arg0: i32, %arg1: i32) -> (i32, i32) {
    %c0_i32 = arith.constant 0 : i32
    return %arg0, %arg1 : i32, i32
  }
}

</mosaic_0001>

<bundles_post_ra>
// kernel: tpu_custom_call.1
= control target key start
LH: loop header
LB: loop body
LE: loop exit
PB: predicated region body
PF: predicated region fallthrough
CT: control target
= control target key end

     0   :  { %s1187_s0 = inlined_call_operand.hbm [shape: f32[32,32], index: 0, kind: input, shape index: {}]   ;;  %s1188_s1 = inlined_call_operand.hbm [shape: bf16[32,128], index: 1, kind: input, shape index: {}]   ;;  %s1189_s2 = inlined_call_operand.vmem [shape: f32[1,128], index: 2, kind: input, shape index: {}]   ;;  %s1190_s3 = inlined_call_operand.hbm [shape: bf16[128,128], index: 3, kind: input, shape index: {}]   ;;  %s1191_s4 = inlined_call_operand.vmem [shape: f32[1,128], index: 4, kind: input, shape index: {}]   ;;  %s1192_s5 = inlined_call_operand.hbm [shape: f32[32,128], index: 5, kind: output, shape index: {}]  }
   0x1   :  { %1196 = sst [smem:[#allocation13_spill]] %s1188_s1 }
   0x2   :  { %10 = vsyncpa [#allocation4], 0 }
   0x3   :  { %12 = vsyncpa [#allocation4 + $0x1], 0 }
   0x4   :  { %13 = vsyncpa [#allocation7], 0 }
   0x5   :  { %14 = vsyncpa [#allocation5], 0 }
   0x6   :  { %16 = vsyncpa [#allocation5 + $0x1], 0  ;;  %s993_s18 = smov 0   ;;  %s995_s19 = smov 0  }
   0x7   :  { %s997_s20 = smov 0   ;;  %s999_s21 = smov 0  }
   0x8   :  { %s1001_s22 = smov 0   ;;  %s1003_s23 = smov 0  }
   0x9 LB: > { %s621_s24 = sadd.s32 4294967295, %s953_s23   ;;  %s622_s25 = sadd.s32 4294967294, %s953_s23   ;;  %s953_s23 = sphi %s1003_s23, %s22_s23   ;;  %s949_s22 = sphi %s1001_s22, %s1213_s22   ;;  %s945_s21 = sphi %s999_s21, %s1212_s21   ;;  %s941_s20 = sphi %s997_s20, %s1211_s20   ;;  %s937_s19 = sphi %s995_s19, %s1210_s19   ;;  %s933_s18 = sphi %s993_s18, %s1209_s18  }
   0xa   : > { %p54_p0 = scmp.ne.s32.totalorder %s937_s19, %s933_s18  ;;  %p1027_p1 = scmp.eq.s32.totalorder %s621_s24, 0 }
   0xb   : > { %p1031_p2 = scmp.eq.s32.totalorder %s621_s24, 3  ;;  %p180_p3 = scmp.eq.s32.totalorder %s622_s25, 3 }
   0xc   : > { %s1197_s26 = scalar_select %p1027_p1, 1, 0 }
   0xd   : > { %p1037_p4 = por %p1027_p1, %p54_p0  ;;  %p623_p5 = scmp.ge.s32.totalorder %s953_s23, 1 }
   0xe   : > { %p1042_p6 = por %p180_p3, %p54_p0  ;;  %p187_p7 = scmp.lt.s32.totalorder %s953_s23, 5 }
   0xf   : > { %s1199_s28 = scalar_select %p1037_p4, 1, 0 }
  0x10   : > { %s1200_s29 = scalar_select %p1042_p6, 1, 0 }
  0x11   : > { %p1047_p8 = pnand %p623_p5, %p187_p7  ;;  %s955_s6 = smov [#allocation6]  }
  0x12   : > { %s199_s7 = sshll.u32 %s955_s6, 4  ;;  %s956_s9 = smov [#allocation8]   ;;  %s200_s7 = int_to_ptr.vmem [resolvable:$true] %s199_s7 }
  0x13   : > { %p704_p9 = pneg %p1047_p8  ;;  %s217_s10 = sshll.u32 %s956_s9, 4  ;;  %s218_s10 = int_to_ptr.vmem [resolvable:$true] %s217_s10 }
  0x14   : > { %s800_s11 = scalar_lea.vmem %s200_s7, 256  ;;  %p808_p3 = scmp.lt.s32.totalorder %s200_s7, %s200_s7 }
  0x15   : > { %p1055_p10 = pnand %p704_p9, %p1027_p1  ;;  %p801_p12 = scmp.ne.s32.totalorder %s200_s7, %s800_s11 }
  0x16   : > { %p809_p5 = scmp.lt.s32.totalorder %s800_s11, %s800_s11 }
  0x17   : > { %p791_p11 = pneg %p1055_p10 }
  0x18   : > { %p810_p7 = por %p809_p5, %p808_p3 }
  0x19   : > { %p803_p13 = pnand %p801_p12, %p791_p11 }
  0x1b   : > { %p804_p0 = pneg %p803_p13 }
  0x1d   : > { %p811_p9 = pnand %p810_p7, %p804_p0 }
  0x1f   : > { %814 = shalt.err (!%p811_p9)
}
  0x20   : > { %s957_s12 = smov 64   ;;  %s958_s13 = smov 4  }
  0x21   : > { %s1203_s1 = sld [smem:[#allocation13_spill]]  ;;  %s826_s16 = scalar_lea.vmem %s218_s10, 1024 }
  0x22   : > { %p827_p6 = scmp.ne.s32.totalorder %s218_s10, %s826_s16  ;;  %p834_p1 = scmp.lt.s32.totalorder %s218_s10, %s218_s10 }
  0x23   : > { %p835_p4 = scmp.lt.s32.totalorder %s826_s16, %s826_s16 }
  0x24   : > { %p829_p12 = pnand %p827_p6, %p791_p11 }
  0x25   : > { %p836_p3 = por %p835_p4, %p834_p1 }
  0x26   : > { %p830_p13 = pneg %p829_p12 }
  0x27   : > { %707 = dma.hbm_to_vmem [thread:$0]  (!%p1055_p10), %s1203_s1, 256, %s200_s7, [#allocation7], %s957_s12, %s957_s12, %s958_s13  }
  0x28   : > { %p837_p0 = pnand %p836_p3, %p830_p13 }
  0x2a   : > { %840 = shalt.err (!%p837_p0)
}
  0x2b   : > { %710 = dma.hbm_to_vmem [thread:$0]  (!%p1055_p10), %s1190_s3, 1024, %s218_s10, [#allocation7], %s957_s12, %s957_s12, %s958_s13  }
  0x2c   : > { %s34_s25 = sadd.s32 1, %s949_s22  ;;  %s41_s6 = sadd.s32 1, %s941_s20 }
  0x2d   : > { %p36_p1 = scmp.ge.s32.totalorder %s34_s25, 4  ;;  %p48_p4 = scmp.ne.s32.totalorder %s941_s20, %s937_s19 }
  0x2e   : > { %p49_p6 = scmp.eq.s32.totalorder %s953_s23, 0  ;;  %p721_p11 = scmp.lt.s32.totalorder %s953_s23, 4 }
  0x2f   : > { %s1215_s25 = smov (%p36_p1, %s34_s25), 0  ;;  %p1087_p7 = por %p1031_p2, %p48_p4 }
  0x30   : > { %p50_p5 = por %p49_p6, %p48_p4  ;;  %s38_s8 = ssub.s32 %s949_s22, %s1215_s25 }
  0x31   : > { %s237_s9 = sand.u32 1, %s941_s20   ;;  %p39_p9 = scmp.eq.s32.totalorder %s38_s8, 0 }
  0x32   : > { %s628_s10 = sshll.u32 %s237_s9, 3  ;;  %s629_s11 = sshll.u32 %s949_s22, 7 }
  0x33   : > { %s1096_s12 = scalar_select %p39_p9, %s941_s20, %s41_s6  }
  0x34   : > { %s246_s15 = scalar_lea.hbm %s1187_s0, %s629_s11  ;;  %s241_s16 = scalar_lea.vmem [#allocation3], %s628_s10 }
  0x35   : > { %s248_s17 = sshll.u32 %s241_s16, 4  ;;  %p1103_p10 = pnand %p721_p11, %p50_p5  ;;  %s249_s17 = int_to_ptr.vmem [resolvable:$true] %s248_s17 }
  0x36   : > { %s238_s24 = scalar_lea.sflag [#allocation4], %s237_s9  ;;  %s854_s8 = scalar_lea.vmem %s249_s17, 128 }
  0x37   : > { %p843_p2 = pneg %p1103_p10  ;;  %p855_p12 = scmp.ne.s32.totalorder %s249_s17, %s854_s8 }
  0x38   : > { %s959_s6 = smov [#allocation3]  }
  0x39   : > { %p857_p13 = pnand %p855_p12, %p843_p2  ;;  %s859_s1 = sshll.u32 %s959_s6, 4  ;;  %s860_s1 = int_to_ptr.vmem [resolvable:$false] %s859_s1 }
  0x3a   : > { %s861_s11 = scalar_lea.vmem %s860_s1, 256  ;;  %p862_p0 = scmp.lt.s32.totalorder %s249_s17, %s860_s1 }
  0x3b   : > { %p858_p3 = pneg %p857_p13  ;;  %p863_p1 = scmp.lt.s32.totalorder %s861_s11, %s854_s8 }
  0x3d   : > { %p864_p4 = por %p863_p1, %p862_p0 }
  0x3f   : > { %p865_p6 = pnand %p864_p4, %p858_p3 }
  0x41   : > { %868 = shalt.err (!%p865_p6)
}
  0x42   : > { %714 = dma.hbm_to_vmem [thread:$0]  (!%p1103_p10), %s246_s15, 128, %s249_s17, %s238_s24  }
  0x43   : > { %257 = sbr.rel (%p1047_p8) target bundleno = 502 (0x1f6), region = 40  ;;  %s1114_s9 = sand.u32 (!%p1047_p8), 1, %s937_s19  }
  0x44   : > { %s631_s10 = sshll.u32 (!%p1047_p8), %s1114_s9, 3  ;;  %s260_s13 = scalar_lea.sflag (!%p1047_p8), [#allocation4], %s1114_s9 }
  0x45   : > { %s263_s1 = scalar_lea.vmem (!%p1047_p8), [#allocation3], %s631_s10  ;;  %p1206_p11 = scmp.ne.s32.totalorder (!%p1047_p8), %s1199_s28, 0 }
  0x48   : > { %920 = dma.done.wait (%p1206_p11), %s260_s13, 128  }
  0x49   : > { %922 = vsyncadd (%p1206_p11), %s260_s13, 4294967168  ;;  %p1207_p5 = scmp.ne.s32.totalorder %s1197_s26, 0 }
  0x4b   : > { %924 = dma.done.wait (%p1207_p5), [#allocation7], 1280  }
  0x4c   : > { %926 = vsyncadd (%p1207_p5), [#allocation7], 4294966016  ;;  %v960_v0 = vmov 0.0   ;;  %vm961_vm0 = vmmov 0   ;;  %v779_v1 = vld [vmem:[#allocation6 + $0x8] sm:$0xff]   ;;  %v780_v2 = vld [vmem:[#allocation6] sm:$0xff]  }
  0x4d   : > { %664 = vmatprep.subr.bf16.mxu0 %v960_v0  ;;  %668 = vmatprep.mubr.msk.bf16.mxu0 %vm961_vm0, %v960_v0  ;;  %v309_v3 = vld [vmem:[%s263_s1] sm:$0xff]  ;;  %v781_v4 = vld [vmem:[#allocation8 + $0x38] sm:$0xff]   ;;  %v782_v6 = vld [vmem:[#allocation8 + $0x30] sm:$0xff]   ;;  %vm334_vm1 = vcmask 261120   ;;  %s649_s15 = sshll.u32 %s945_s21, 7  ;;  %s300_s16 = scalar_lea.vmem [#allocation9], %s631_s10 }
  0x4e   : > { %672 = vmatprep.subr.bf16.mxu1 %v960_v0  ;;  %688 = vmatprep.mubr.msk.bf16.mxu1 %vm961_vm0, %v960_v0  ;;  %v310_v5 = vpack.c.bf16 %v309_v3, %v309_v3  ;;  %v783_v7 = vld [vmem:[#allocation8 + $0x28] sm:$0xff]   ;;  %v784_v8 = vld [vmem:[#allocation8 + $0x20] sm:$0xff]   ;;  %v785_v9 = vld [vmem:[#allocation8 + $0x18] sm:$0xff]   ;;  %s509_s17 = sshll.u32 %s300_s16, 4  ;;  %s1140_s8 = scalar_lea.hbm %s1192_s5, %s649_s15  ;;  %s1142_s17 = int_to_ptr.vmem [resolvable:$true] %s509_s17 }
  0x4f   : > { %665 = vmatpush3.bf16.msra.mxu0 %v779_v1  ;;  %673 = vmatpush3.bf16.msra.mxu1 %v781_v4  ;;  %v786_v10 = vld [vmem:[#allocation8 + $0x10] sm:$0xff]   ;;  %v787_v11 = vld [vmem:[#allocation8 + $0x8] sm:$0xff]   ;;  %v788_v12 = vld [vmem:[#allocation8] sm:$0xff]   ;;  %s495_s6 = scalar_lea.sflag [#allocation5], %s1114_s9  ;;  %s869_s21 = scalar_lea.vmem %s1142_s17, 128 }
  0x50   : > { %666 = vmatprep.subr.bf16.mxu0 %v960_v0  ;;  %674 = vmatprep.subr.bf16.mxu1 %v960_v0  ;;  %v635_v13 = vld [vmem:[%s1189_s2] ss:$0 sm:$0xff]  ;;  %p870_p8 = scmp.ne.s32.totalorder %s1142_s17, %s869_s21  ;;  %s962_s11 = smov [#allocation9]  }
  0x51   : > { %v639_v22 = vld [vmem:[%s1191_s4] ss:$0 sm:$0xff]  ;;  %s873_s10 = sshll.u32 %s962_s11, 4  ;;  %s874_s10 = int_to_ptr.vmem [resolvable:$false] %s873_s10 }
  0x52   : > { %p871_p9 = pnand %p870_p8, %p1087_p7  ;;  %s875_s13 = scalar_lea.vmem %s874_s10, 256 }
  0x53   : > { %667 = vmatpush3.bf16.msra.mxu0 %v780_v2  ;;  %675 = vmatpush3.bf16.msra.mxu1 %v782_v6  ;;  %p876_p2 = scmp.lt.s32.totalorder %s1142_s17, %s874_s10  ;;  %p877_p12 = scmp.lt.s32.totalorder %s875_s13, %s869_s21 }
  0x54   : > { %676 = vmatprep.subr.bf16.mxu1 %v960_v0  ;;  %p872_p10 = pneg %p871_p9 }
  0x55   : > { %p878_p13 = por %p877_p12, %p876_p2 }
  0x56   : > { %669 = vmatmul.mubr.msk.bf16.vlgmr.msra.gmra.mxu0 %vm334_vm1, %v310_v5 }
  0x57   : > { %677 = vmatpush3.bf16.msra.mxu1 %v783_v7  ;;  %p879_p3 = pnand %p878_p13, %p872_p10 }
  0x58   : > { %678 = vmatprep.subr.bf16.mxu1 %v960_v0 }
  0x5b   : > { %679 = vmatpush3.bf16.msra.mxu1 %v784_v8 }
  0x5c   : > { %680 = vmatprep.subr.bf16.mxu1 %v960_v0 }
  0x5f   : > { %681 = vmatpush3.bf16.msra.mxu1 %v785_v9 }
  0x60   : > { %682 = vmatprep.subr.bf16.mxu1 %v960_v0 }
  0x63   : > { %683 = vmatpush3.bf16.msra.mxu1 %v786_v10 }
  0x64   : > { %684 = vmatprep.subr.bf16.mxu1 %v960_v0 }
  0x67   : > { %685 = vmatpush3.bf16.msra.mxu1 %v787_v11 }
  0x68   : > { %686 = vmatprep.subr.bf16.mxu1 %v960_v0 }
  0x6b   : > { %687 = vmatpush3.bf16.msra.mxu1 %v788_v12 }
 0x116   : > { %v372_v14 = vpop.f32.mrf.mxu0 }
 0x117   : > { %v373_v15 = vadd.f32 %v635_v13, %v372_v14 }
 0x118   : > { %v670_v16 = vpop.f32.mrf.mxu0 }
 0x119   : > { %v378_v17 = vmax.f32 %v373_v15, 0.0 }
 0x11a   : > { %v375_v18 = vpop.f32.mrf.mxu0 }
 0x11b   : > { %v379_v19 = vpack.c.bf16 %v378_v17, %v378_v17 }
 0x11c   : > { %v671_v20 = vpop.f32.mrf.mxu0 }
 0x11d   : > { %380 = vst [vmem:[#allocation2] sm:$0xf] %v379_v19 }
 0x124   : > { %v381_v21 = vld [vmem:[#allocation2] sm:$0xf] }
 0x125   : > { %689 = vmatmul.mubr.bf16.vlgmr.msra.gmra.mxu1 %v381_v21 }
 0x1e5   : > { %v487_v23 = vpop.f32.mrf.mxu1 }
 0x1e6   : > { %v488_v24 = vadd.f32 %v639_v22, %v487_v23 }
 0x1e7   : > { %v690_v25 = vpop.f32.mrf.mxu1 }
 0x1e8   : > { %493 = vst [vmem:[%s300_s16] sm:$0xff] %v488_v24 }
 0x1e9   : > { %v490_v26 = vpop.f32.mrf.mxu1 }
 0x1ea   : > { %882 = shalt.err (!%p879_p3)
}
 0x1eb   : > { %s883_s1 = scalar_lea.hbm %s1140_s8, 128  ;;  %s887_s28 = scalar_lea.hbm %s1192_s5, 512 }
 0x1ec   : > { %p884_p0 = scmp.ne.s32.totalorder %s1140_s8, %s883_s1  ;;  %p888_p6 = scmp.lt.s32.totalorder %s1140_s8, %s1192_s5 }
 0x1ed   : > { %p889_p11 = scmp.lt.s32.totalorder %s887_s28, %s883_s1 }
 0x1ee   : > { %p885_p1 = pnand %p884_p0, %p1087_p7 }
 0x1ef   : > { %p890_p5 = por %p889_p11, %p888_p6 }
 0x1f0   : > { %p886_p4 = pneg %p885_p1 }
 0x1f2   : > { %p891_p8 = pnand %p890_p5, %p886_p4 }
 0x1f4   : > { %894 = shalt.err (!%p891_p8)
}
 0x1f5   : > { %702 = dma.vmem_to_hbm [thread:$0]  (%p1087_p7), %s1142_s17, 128, %s1140_s8, %s495_s6   ;;  %v691_v27 = vpop.f32.mrf.mxu1 }
 0x1f6 PF: > { %p724_p9 = scmp.ge.s32.totalorder %s953_s23, 2  ;;  %s521_s15 = sand.u32 1, %s933_s18  }
 0x1f7   : > { %p1208_p10 = scmp.ne.s32.totalorder %s1200_s29, 0  ;;  %s522_s16 = scalar_lea.sflag [#allocation5], %s521_s15 }
 0x1f9   : > { %p716_p2 = pnand %p724_p9, %p1208_p10 }
 0x1fb   : > { %p717_p12 = pneg %p716_p2 }
 0x1fd   : > { %928 = dma.done.wait (%p717_p12), %s522_s16, 128  }
 0x1fe   : > { %930 = vsyncadd (%p717_p12), %s522_s16, 4294967168  ;;  %s22_s23 = sadd.s32 1, %s953_s23   ;;  %s1209_s18 = smov %s937_s19 }
 0x1ff   : > { %p19_p13 = scmp.ge.s32.totalorder %s22_s23, 6   ;;  %s1210_s19 = smov %s941_s20 }
 0x200   : > { %s1211_s20 = smov %s1096_s12  ;;  %s1212_s21 = smov %s949_s22 }
 0x201   : > { %s1213_s22 = smov %s1215_s25  ;;  %21 = sbr.rel (!%p19_p13) target bundleno = 9 (0x9), region = 101 }
 0x206   :  { %527 = vsyncpa [#allocation4], 1 }
 0x207   :  { %529 = vsyncpa [#allocation4 + $0x1], 1 }
 0x208   :  { %530 = vsyncpa [#allocation7], 1 }
 0x209   :  { %531 = vsyncpa [#allocation5], 1 }
 0x20a   :  { %533 = vsyncpa [#allocation5 + $0x1], 1 }

// kernel: tpu_custom_call.1
= control target key start
LH: loop header
LB: loop body
LE: loop exit
PB: predicated region body
PF: predicated region fallthrough
CT: control target
= control target key end

     0   :  { %s1187_s0 = inlined_call_operand.hbm [shape: f32[32,32], index: 0, kind: input, shape index: {}]   ;;  %s1188_s1 = inlined_call_operand.hbm [shape: bf16[32,128], index: 1, kind: input, shape index: {}]   ;;  %s1189_s2 = inlined_call_operand.vmem [shape: f32[1,128], index: 2, kind: input, shape index: {}]   ;;  %s1190_s3 = inlined_call_operand.hbm [shape: bf16[128,128], index: 3, kind: input, shape index: {}]   ;;  %s1191_s4 = inlined_call_operand.vmem [shape: f32[1,128], index: 4, kind: input, shape index: {}]   ;;  %s1192_s5 = inlined_call_operand.hbm [shape: f32[32,128], index: 5, kind: output, shape index: {}]  }
   0x1   :  { %1196 = sst [smem:[#allocation13_spill]] %s1188_s1 }
   0x2   :  { %10 = vsyncpa [#allocation4], 0 }
   0x3   :  { %12 = vsyncpa [#allocation4 + $0x1], 0 }
   0x4   :  { %13 = vsyncpa [#allocation7], 0 }
   0x5   :  { %14 = vsyncpa [#allocation5], 0 }
   0x6   :  { %16 = vsyncpa [#allocation5 + $0x1], 0  ;;  %s993_s18 = smov 0   ;;  %s995_s19 = smov 0  }
   0x7   :  { %s997_s20 = smov 0   ;;  %s999_s21 = smov 0  }
   0x8   :  { %s1001_s22 = smov 0   ;;  %s1003_s23 = smov 0  }
   0x9 LB: > { %s621_s24 = sadd.s32 4294967295, %s953_s23   ;;  %s622_s25 = sadd.s32 4294967294, %s953_s23   ;;  %s953_s23 = sphi %s1003_s23, %s22_s23   ;;  %s949_s22 = sphi %s1001_s22, %s1213_s22   ;;  %s945_s21 = sphi %s999_s21, %s1212_s21   ;;  %s941_s20 = sphi %s997_s20, %s1211_s20   ;;  %s937_s19 = sphi %s995_s19, %s1210_s19   ;;  %s933_s18 = sphi %s993_s18, %s1209_s18  }
   0xa   : > { %p54_p0 = scmp.ne.s32.totalorder %s937_s19, %s933_s18  ;;  %p1027_p1 = scmp.eq.s32.totalorder %s621_s24, 0 }
   0xb   : > { %p1031_p2 = scmp.eq.s32.totalorder %s621_s24, 3  ;;  %p180_p3 = scmp.eq.s32.totalorder %s622_s25, 3 }
   0xc   : > { %s1197_s26 = scalar_select %p1027_p1, 1, 0 }
   0xd   : > { %p1037_p4 = por %p1027_p1, %p54_p0  ;;  %p623_p5 = scmp.ge.s32.totalorder %s953_s23, 1 }
   0xe   : > { %p1042_p6 = por %p180_p3, %p54_p0  ;;  %p187_p7 = scmp.lt.s32.totalorder %s953_s23, 5 }
   0xf   : > { %s1199_s28 = scalar_select %p1037_p4, 1, 0 }
  0x10   : > { %s1200_s29 = scalar_select %p1042_p6, 1, 0 }
  0x11   : > { %p1047_p8 = pnand %p623_p5, %p187_p7  ;;  %s955_s6 = smov [#allocation6]  }
  0x12   : > { %s199_s7 = sshll.u32 %s955_s6, 4  ;;  %s956_s9 = smov [#allocation8]   ;;  %s200_s7 = int_to_ptr.vmem [resolvable:$true] %s199_s7 }
  0x13   : > { %p704_p9 = pneg %p1047_p8  ;;  %s217_s10 = sshll.u32 %s956_s9, 4  ;;  %s218_s10 = int_to_ptr.vmem [resolvable:$true] %s217_s10 }
  0x14   : > { %s800_s11 = scalar_lea.vmem %s200_s7, 256  ;;  %p808_p3 = scmp.lt.s32.totalorder %s200_s7, %s200_s7 }
  0x15   : > { %p1055_p10 = pnand %p704_p9, %p1027_p1  ;;  %p801_p12 = scmp.ne.s32.totalorder %s200_s7, %s800_s11 }
  0x16   : > { %p809_p5 = scmp.lt.s32.totalorder %s800_s11, %s800_s11 }
  0x17   : > { %p791_p11 = pneg %p1055_p10 }
  0x18   : > { %p810_p7 = por %p809_p5, %p808_p3 }
  0x19   : > { %p803_p13 = pnand %p801_p12, %p791_p11 }
  0x1b   : > { %p804_p0 = pneg %p803_p13 }
  0x1d   : > { %p811_p9 = pnand %p810_p7, %p804_p0 }
  0x1f   : > { %814 = shalt.err (!%p811_p9)
}
  0x20   : > { %s957_s12 = smov 64   ;;  %s958_s13 = smov 4  }
  0x21   : > { %s1203_s1 = sld [smem:[#allocation13_spill]]  ;;  %s826_s16 = scalar_lea.vmem %s218_s10, 1024 }
  0x22   : > { %p827_p6 = scmp.ne.s32.totalorder %s218_s10, %s826_s16  ;;  %p834_p1 = scmp.lt.s32.totalorder %s218_s10, %s218_s10 }
  0x23   : > { %p835_p4 = scmp.lt.s32.totalorder %s826_s16, %s826_s16 }
  0x24   : > { %p829_p12 = pnand %p827_p6, %p791_p11 }
  0x25   : > { %p836_p3 = por %p835_p4, %p834_p1 }
  0x26   : > { %p830_p13 = pneg %p829_p12 }
  0x27   : > { %707 = dma.hbm_to_vmem [thread:$0]  (!%p1055_p10), %s1203_s1, 256, %s200_s7, [#allocation7], %s957_s12, %s957_s12, %s958_s13  }
  0x28   : > { %p837_p0 = pnand %p836_p3, %p830_p13 }
  0x2a   : > { %840 = shalt.err (!%p837_p0)
}
  0x2b   : > { %710 = dma.hbm_to_vmem [thread:$0]  (!%p1055_p10), %s1190_s3, 1024, %s218_s10, [#allocation7], %s957_s12, %s957_s12, %s958_s13  }
  0x2c   : > { %s34_s25 = sadd.s32 1, %s949_s22  ;;  %s41_s6 = sadd.s32 1, %s941_s20 }
  0x2d   : > { %p36_p1 = scmp.ge.s32.totalorder %s34_s25, 4  ;;  %p48_p4 = scmp.ne.s32.totalorder %s941_s20, %s937_s19 }
  0x2e   : > { %p49_p6 = scmp.eq.s32.totalorder %s953_s23, 0  ;;  %p721_p11 = scmp.lt.s32.totalorder %s953_s23, 4 }
  0x2f   : > { %s1215_s25 = smov (%p36_p1, %s34_s25), 0  ;;  %p1087_p7 = por %p1031_p2, %p48_p4 }
  0x30   : > { %p50_p5 = por %p49_p6, %p48_p4  ;;  %s38_s8 = ssub.s32 %s949_s22, %s1215_s25 }
  0x31   : > { %s237_s9 = sand.u32 1, %s941_s20   ;;  %p39_p9 = scmp.eq.s32.totalorder %s38_s8, 0 }
  0x32   : > { %s628_s10 = sshll.u32 %s237_s9, 3  ;;  %s629_s11 = sshll.u32 %s949_s22, 7 }
  0x33   : > { %s1096_s12 = scalar_select %p39_p9, %s941_s20, %s41_s6  }
  0x34   : > { %s246_s15 = scalar_lea.hbm %s1187_s0, %s629_s11  ;;  %s241_s16 = scalar_lea.vmem [#allocation3], %s628_s10 }
  0x35   : > { %s248_s17 = sshll.u32 %s241_s16, 4  ;;  %p1103_p10 = pnand %p721_p11, %p50_p5  ;;  %s249_s17 = int_to_ptr.vmem [resolvable:$true] %s248_s17 }
  0x36   : > { %s238_s24 = scalar_lea.sflag [#allocation4], %s237_s9  ;;  %s854_s8 = scalar_lea.vmem %s249_s17, 128 }
  0x37   : > { %p843_p2 = pneg %p1103_p10  ;;  %p855_p12 = scmp.ne.s32.totalorder %s249_s17, %s854_s8 }
  0x38   : > { %s959_s6 = smov [#allocation3]  }
  0x39   : > { %p857_p13 = pnand %p855_p12, %p843_p2  ;;  %s859_s1 = sshll.u32 %s959_s6, 4  ;;  %s860_s1 = int_to_ptr.vmem [resolvable:$false] %s859_s1 }
  0x3a   : > { %s861_s11 = scalar_lea.vmem %s860_s1, 256  ;;  %p862_p0 = scmp.lt.s32.totalorder %s249_s17, %s860_s1 }
  0x3b   : > { %p858_p3 = pneg %p857_p13  ;;  %p863_p1 = scmp.lt.s32.totalorder %s861_s11, %s854_s8 }
  0x3d   : > { %p864_p4 = por %p863_p1, %p862_p0 }
  0x3f   : > { %p865_p6 = pnand %p864_p4, %p858_p3 }
  0x41   : > { %868 = shalt.err (!%p865_p6)
}
  0x42   : > { %714 = dma.hbm_to_vmem [thread:$0]  (!%p1103_p10), %s246_s15, 128, %s249_s17, %s238_s24  }
  0x43   : > { %257 = sbr.rel (%p1047_p8) target bundleno = 502 (0x1f6), region = 40  ;;  %s1114_s9 = sand.u32 (!%p1047_p8), 1, %s937_s19  }
  0x44   : > { %s631_s10 = sshll.u32 (!%p1047_p8), %s1114_s9, 3  ;;  %s260_s13 = scalar_lea.sflag (!%p1047_p8), [#allocation4], %s1114_s9 }
  0x45   : > { %s263_s1 = scalar_lea.vmem (!%p1047_p8), [#allocation3], %s631_s10  ;;  %p1206_p11 = scmp.ne.s32.totalorder (!%p1047_p8), %s1199_s28, 0 }
  0x48   : > { %920 = dma.done.wait (%p1206_p11), %s260_s13, 128  }
  0x49   : > { %922 = vsyncadd (%p1206_p11), %s260_s13, 4294967168  ;;  %p1207_p5 = scmp.ne.s32.totalorder %s1197_s26, 0 }
  0x4b   : > { %924 = dma.done.wait (%p1207_p5), [#allocation7], 1280  }
  0x4c   : > { %926 = vsyncadd (%p1207_p5), [#allocation7], 4294966016  ;;  %v960_v0 = vmov 0.0   ;;  %vm961_vm0 = vmmov 0   ;;  %v779_v1 = vld [vmem:[#allocation6 + $0x8] sm:$0xff]   ;;  %v780_v2 = vld [vmem:[#allocation6] sm:$0xff]  }
  0x4d   : > { %664 = vmatprep.subr.bf16.mxu0 %v960_v0  ;;  %668 = vmatprep.mubr.msk.bf16.mxu0 %vm961_vm0, %v960_v0  ;;  %v309_v3 = vld [vmem:[%s263_s1] sm:$0xff]  ;;  %v781_v4 = vld [vmem:[#allocation8 + $0x38] sm:$0xff]   ;;  %v782_v6 = vld [vmem:[#allocation8 + $0x30] sm:$0xff]   ;;  %vm334_vm1 = vcmask 261120   ;;  %s649_s15 = sshll.u32 %s945_s21, 7  ;;  %s300_s16 = scalar_lea.vmem [#allocation9], %s631_s10 }
  0x4e   : > { %672 = vmatprep.subr.bf16.mxu1 %v960_v0  ;;  %688 = vmatprep.mubr.msk.bf16.mxu1 %vm961_vm0, %v960_v0  ;;  %v310_v5 = vpack.c.bf16 %v309_v3, %v309_v3  ;;  %v783_v7 = vld [vmem:[#allocation8 + $0x28] sm:$0xff]   ;;  %v784_v8 = vld [vmem:[#allocation8 + $0x20] sm:$0xff]   ;;  %v785_v9 = vld [vmem:[#allocation8 + $0x18] sm:$0xff]   ;;  %s509_s17 = sshll.u32 %s300_s16, 4  ;;  %s1140_s8 = scalar_lea.hbm %s1192_s5, %s649_s15  ;;  %s1142_s17 = int_to_ptr.vmem [resolvable:$true] %s509_s17 }
  0x4f   : > { %665 = vmatpush3.bf16.msra.mxu0 %v779_v1  ;;  %673 = vmatpush3.bf16.msra.mxu1 %v781_v4  ;;  %v786_v10 = vld [vmem:[#allocation8 + $0x10] sm:$0xff]   ;;  %v787_v11 = vld [vmem:[#allocation8 + $0x8] sm:$0xff]   ;;  %v788_v12 = vld [vmem:[#allocation8] sm:$0xff]   ;;  %s495_s6 = scalar_lea.sflag [#allocation5], %s1114_s9  ;;  %s869_s21 = scalar_lea.vmem %s1142_s17, 128 }
  0x50   : > { %666 = vmatprep.subr.bf16.mxu0 %v960_v0  ;;  %674 = vmatprep.subr.bf16.mxu1 %v960_v0  ;;  %v635_v13 = vld [vmem:[%s1189_s2] ss:$0 sm:$0xff]  ;;  %p870_p8 = scmp.ne.s32.totalorder %s1142_s17, %s869_s21  ;;  %s962_s11 = smov [#allocation9]  }
  0x51   : > { %v639_v22 = vld [vmem:[%s1191_s4] ss:$0 sm:$0xff]  ;;  %s873_s10 = sshll.u32 %s962_s11, 4  ;;  %s874_s10 = int_to_ptr.vmem [resolvable:$false] %s873_s10 }
  0x52   : > { %p871_p9 = pnand %p870_p8, %p1087_p7  ;;  %s875_s13 = scalar_lea.vmem %s874_s10, 256 }
  0x53   : > { %667 = vmatpush3.bf16.msra.mxu0 %v780_v2  ;;  %675 = vmatpush3.bf16.msra.mxu1 %v782_v6  ;;  %p876_p2 = scmp.lt.s32.totalorder %s1142_s17, %s874_s10  ;;  %p877_p12 = scmp.lt.s32.totalorder %s875_s13, %s869_s21 }
  0x54   : > { %676 = vmatprep.subr.bf16.mxu1 %v960_v0  ;;  %p872_p10 = pneg %p871_p9 }
  0x55   : > { %p878_p13 = por %p877_p12, %p876_p2 }
  0x56   : > { %669 = vmatmul.mubr.msk.bf16.vlgmr.msra.gmra.mxu0 %vm334_vm1, %v310_v5 }
  0x57   : > { %677 = vmatpush3.bf16.msra.mxu1 %v783_v7  ;;  %p879_p3 = pnand %p878_p13, %p872_p10 }
  0x58   : > { %678 = vmatprep.subr.bf16.mxu1 %v960_v0 }
  0x5b   : > { %679 = vmatpush3.bf16.msra.mxu1 %v784_v8 }
  0x5c   : > { %680 = vmatprep.subr.bf16.mxu1 %v960_v0 }
  0x5f   : > { %681 = vmatpush3.bf16.msra.mxu1 %v785_v9 }
  0x60   : > { %682 = vmatprep.subr.bf16.mxu1 %v960_v0 }
  0x63   : > { %683 = vmatpush3.bf16.msra.mxu1 %v786_v10 }
  0x64   : > { %684 = vmatprep.subr.bf16.mxu1 %v960_v0 }
  0x67   : > { %685 = vmatpush3.bf16.msra.mxu1 %v787_v11 }
  0x68   : > { %686 = vmatprep.subr.bf16.mxu1 %v960_v0 }
  0x6b   : > { %687 = vmatpush3.bf16.msra.mxu1 %v788_v12 }
 0x116   : > { %v372_v14 = vpop.f32.mrf.mxu0 }
 0x117   : > { %v373_v15 = vadd.f32 %v635_v13, %v372_v14 }
 0x118   : > { %v670_v16 = vpop.f32.mrf.mxu0 }
 0x119   : > { %v378_v17 = vmax.f32 %v373_v15, 0.0 }
 0x11a   : > { %v375_v18 = vpop.f32.mrf.mxu0 }
 0x11b   : > { %v379_v19 = vpack.c.bf16 %v378_v17, %v378_v17 }
 0x11c   : > { %v671_v20 = vpop.f32.mrf.mxu0 }
 0x11d   : > { %380 = vst [vmem:[#allocation2] sm:$0xf] %v379_v19 }
 0x124   : > { %v381_v21 = vld [vmem:[#allocation2] sm:$0xf] }
 0x125   : > { %689 = vmatmul.mubr.bf16.vlgmr.msra.gmra.mxu1 %v381_v21 }
 0x1e5   : > { %v487_v23 = vpop.f32.mrf.mxu1 }
 0x1e6   : > { %v488_v24 = vadd.f32 %v639_v22, %v487_v23 }
 0x1e7   : > { %v690_v25 = vpop.f32.mrf.mxu1 }
 0x1e8   : > { %493 = vst [vmem:[%s300_s16] sm:$0xff] %v488_v24 }
 0x1e9   : > { %v490_v26 = vpop.f32.mrf.mxu1 }
 0x1ea   : > { %882 = shalt.err (!%p879_p3)
}
 0x1eb   : > { %s883_s1 = scalar_lea.hbm %s1140_s8, 128  ;;  %s887_s28 = scalar_lea.hbm %s1192_s5, 512 }
 0x1ec   : > { %p884_p0 = scmp.ne.s32.totalorder %s1140_s8, %s883_s1  ;;  %p888_p6 = scmp.lt.s32.totalorder %s1140_s8, %s1192_s5 }
 0x1ed   : > { %p889_p11 = scmp.lt.s32.totalorder %s887_s28, %s883_s1 }
 0x1ee   : > { %p885_p1 = pnand %p884_p0, %p1087_p7 }
 0x1ef   : > { %p890_p5 = por %p889_p11, %p888_p6 }
 0x1f0   : > { %p886_p4 = pneg %p885_p1 }
 0x1f2   : > { %p891_p8 = pnand %p890_p5, %p886_p4 }
 0x1f4   : > { %894 = shalt.err (!%p891_p8)
}
 0x1f5   : > { %702 = dma.vmem_to_hbm [thread:$0]  (%p1087_p7), %s1142_s17, 128, %s1140_s8, %s495_s6   ;;  %v691_v27 = vpop.f32.mrf.mxu1 }
 0x1f6 PF: > { %p724_p9 = scmp.ge.s32.totalorder %s953_s23, 2  ;;  %s521_s15 = sand.u32 1, %s933_s18  }
 0x1f7   : > { %p1208_p10 = scmp.ne.s32.totalorder %s1200_s29, 0  ;;  %s522_s16 = scalar_lea.sflag [#allocation5], %s521_s15 }
 0x1f9   : > { %p716_p2 = pnand %p724_p9, %p1208_p10 }
 0x1fb   : > { %p717_p12 = pneg %p716_p2 }
 0x1fd   : > { %928 = dma.done.wait (%p717_p12), %s522_s16, 128  }
 0x1fe   : > { %930 = vsyncadd (%p717_p12), %s522_s16, 4294967168  ;;  %s22_s23 = sadd.s32 1, %s953_s23   ;;  %s1209_s18 = smov %s937_s19 }
 0x1ff   : > { %p19_p13 = scmp.ge.s32.totalorder %s22_s23, 6   ;;  %s1210_s19 = smov %s941_s20 }
 0x200   : > { %s1211_s20 = smov %s1096_s12  ;;  %s1212_s21 = smov %s949_s22 }
 0x201   : > { %s1213_s22 = smov %s1215_s25  ;;  %21 = sbr.rel (!%p19_p13) target bundleno = 9 (0x9), region = 101 }
 0x206   :  { %527 = vsyncpa [#allocation4], 1 }
 0x207   :  { %529 = vsyncpa [#allocation4 + $0x1], 1 }
 0x208   :  { %530 = vsyncpa [#allocation7], 1 }
 0x209   :  { %531 = vsyncpa [#allocation5], 1 }
 0x20a   :  { %533 = vsyncpa [#allocation5 + $0x1], 1 }

</bundles_post_ra>
